<compile_context>
chip_gen: v6e
topology: v6e:2x2x1
jax: 0.10.0
libtpu: 0.0.40
codegen_flags: <defaults>
</compile_context>

<pallas_src>
import functools

import jax
import jax.numpy as jnp
from jax.experimental import pallas as pl
from jax.experimental.pallas import tpu as pltpu  # noqa: F401  (TPU backend)


_LANES = 128


# ----------------------------------------------------------------------------
# Fused distillation-loss kernel (single invocation, no grid).
#   refs layout: (s_cls, t_cls, s_lvl0, t_lvl0, s_lvl1, t_lvl1, ..., out)
#   out is a lane-dense (1, 128) f32 vector:
#     lane 0     -> distill_cls_loss
#     lane 1 + i -> distill_obj_loss_i
# ----------------------------------------------------------------------------
def _fused_distill_kernel(*refs, temperature, cls_weight, obj_weight,
                          n_rois, level_valid_counts):
    out_ref = refs[-1]
    s_cls_ref, t_cls_ref = refs[0], refs[1]
    level_refs = refs[2:-1]

    # ---- distill classification loss --------------------------------------
    #   t_target = softmax(t_logits / T, dim=1)
    #   s_log_softmax = log_softmax(s_logits, dim=1)
    #   loss = w * ( -(t_target * s_log_softmax).sum() / N )
    s = s_cls_ref[...].astype(jnp.float32)
    t = t_cls_ref[...].astype(jnp.float32) / temperature

    t_max = jnp.max(t, axis=1, keepdims=True)
    t_exp = jnp.exp(t - t_max)
    t_prob = t_exp / jnp.sum(t_exp, axis=1, keepdims=True)

    s_max = jnp.max(s, axis=1, keepdims=True)
    s_shift = s - s_max
    s_lse = jnp.log(jnp.sum(jnp.exp(s_shift), axis=1, keepdims=True))
    s_logsoft = s_shift - s_lse

    cls_loss = -jnp.sum(t_prob * s_logsoft) * (cls_weight / n_rois)

    # ---- per-level objectness distillation ---------------------------------
    #   target = sigmoid(t_objectness_logits)
    #   loss = w * mean( max(s,0) - s*target + log1p(exp(-|s|)) )
    # Inputs arrive lane-dense as (rows, 128) with a zero-padded tail; the
    # tail is masked statically (Python-level branch, no runtime cost when the
    # element count is already a multiple of 128).
    obj_losses = []
    for li, n_valid in enumerate(level_valid_counts):
        sv = level_refs[2 * li][...].astype(jnp.float32)
        tv = jax.nn.sigmoid(level_refs[2 * li + 1][...].astype(jnp.float32))
        per_elem = (jnp.maximum(sv, 0.0) - sv * tv
                    + jnp.log1p(jnp.exp(-jnp.abs(sv))))
        rows, lanes = sv.shape
        if n_valid < rows * lanes:
            flat_idx = (
                jax.lax.broadcasted_iota(jnp.int32, (rows, lanes), 0) * lanes
                + jax.lax.broadcasted_iota(jnp.int32, (rows, lanes), 1))
            per_elem = jnp.where(flat_idx < n_valid, per_elem, 0.0)
        obj_losses.append(jnp.sum(per_elem) * (obj_weight / n_valid))

    # ---- pack scalar losses into one lane-dense (1, 128) store -------------
    lane = jax.lax.broadcasted_iota(jnp.int32, (1, _LANES), 1)
    vec = jnp.where(lane == 0, cls_loss, jnp.zeros((1, _LANES), jnp.float32))
    for li, lv in enumerate(obj_losses):
        vec = jnp.where(lane == (li + 1), lv, vec)
    out_ref[...] = vec


def _flatten_lane_dense(x):
    """Flatten an NCHW objectness map to (rows, 128), zero-padding the tail."""
    flat = x.reshape(-1)
    n_valid = flat.shape[0]
    padded = -(-n_valid // _LANES) * _LANES
    if padded != n_valid:
        flat = jnp.pad(flat, (0, padded - n_valid))
    return flat.reshape(padded // _LANES, _LANES), n_valid


# ----------------------------------------------------------------------------
# DistillModel forward (distillation-loss portion).
# TODO(synk): student/teacher backbone, RPN and ROI heads are external
# sub-modules (maskrcnn-benchmark detectors) with no clean in-script Pallas
# equivalent; their outputs (class logits, objectness logits) are taken as
# inputs here, and the student detector/proposal losses are pass-through.
# ----------------------------------------------------------------------------
class DistillModelPallas:
    def __init__(self, T, distill_roi_cls_weight, distill_obj_weight):
        self.T = T
        self.distill_roi_cls_weight = distill_roi_cls_weight
        self.distill_obj_weight = distill_obj_weight

    def __call__(self, s_class_logits, t_class_logits,
                 s_objectness_logits=(), t_objectness_logits=()):
        n_rois, _ = s_class_logits.shape

        inputs = [s_class_logits, t_class_logits]
        level_valid_counts = []
        if self.distill_obj_weight:
            for s, t in zip(s_objectness_logits, t_objectness_logits):
                s2, n_valid = _flatten_lane_dense(s)
                t2, _ = _flatten_lane_dense(t)
                inputs += [s2, t2]
                level_valid_counts.append(n_valid)
        num_levels = len(level_valid_counts)
        assert num_levels + 1 <= _LANES

        kernel = functools.partial(
            _fused_distill_kernel,
            temperature=float(self.T),
            cls_weight=float(self.distill_roi_cls_weight),
            obj_weight=float(self.distill_obj_weight or 0.0),
            n_rois=float(n_rois),
            level_valid_counts=tuple(level_valid_counts),
        )

        # Grid-free single invocation: every input is a full-array block that
        # lands in VMEM (a few KiB each — far under VMEM on v5e/v6e/v7x).
        out = pl.pallas_call(
            kernel,
            out_shape=jax.ShapeDtypeStruct((1, _LANES), jnp.float32),
        )(*inputs)

        losses = {'distill_cls_loss': out[0, 0]}
        for i in range(num_levels):
            losses['distill_obj_loss_{}'.format(i)] = out[0, i + 1]
        return losses


# ----------------------------------------------------------------------------
# Pure-JAX reference (mirrors the PyTorch math) for verification.
# ----------------------------------------------------------------------------
def _ref_losses(model, s_cls, t_cls, s_obj_list, t_obj_list):
    t_target = jax.nn.softmax(t_cls / model.T, axis=1)
    s_log_softmax = jax.nn.log_softmax(s_cls, axis=1)
    cls = -(t_target * s_log_softmax).sum() / t_cls.shape[0]
    out = {'distill_cls_loss': model.distill_roi_cls_weight * cls}
    for i, (s, t) in enumerate(zip(s_obj_list, t_obj_list)):
        tgt = jax.nn.sigmoid(t)
        bce = jnp.maximum(s, 0.0) - s * tgt + jnp.log1p(jnp.exp(-jnp.abs(s)))
        out['distill_obj_loss_{}'.format(i)] = (
            model.distill_obj_weight * jnp.mean(bce))
    return out


if __name__ == "__main__":
    key = jax.random.PRNGKey(0)
    k1, k2, k3, k4, k5, k6, k7, k8 = jax.random.split(key, 8)

    # config
    model = DistillModelPallas(T=2.0,
                               distill_roi_cls_weight=0.5,
                               distill_obj_weight=0.1)

    # synthetic "distill_info" tensors (what the ROI heads / RPN would emit)
    n_rois, n_classes = 64, 16          # ROI class logits (N, C)
    s_cls = jax.random.normal(k1, (n_rois, n_classes), jnp.float32)
    t_cls = jax.random.normal(k2, (n_rois, n_classes), jnp.float32)

    # three FPN levels of RPN objectness logits, NCHW: [B, A, H, W]
    # (third level deliberately NOT a multiple of 128 elements to exercise
    #  the lane-dense tail-masking path)
    s_obj = [
        jax.random.normal(k3, (2, 4, 16, 16), jnp.float32),
        jax.random.normal(k4, (2, 4, 8, 8), jnp.float32),
        jax.random.normal(k7, (2, 3, 5, 7), jnp.float32),
    ]
    t_obj = [
        jax.random.normal(k5, (2, 4, 16, 16), jnp.float32),
        jax.random.normal(k6, (2, 4, 8, 8), jnp.float32),
        jax.random.normal(k8, (2, 3, 5, 7), jnp.float32),
    ]

    losses = model(s_cls, t_cls, s_obj, t_obj)
    losses = {k: jax.block_until_ready(v) for k, v in losses.items()}

    ref = _ref_losses(model, s_cls, t_cls, s_obj, t_obj)
    for name, val in losses.items():
        assert jnp.allclose(val, ref[name], rtol=1e-5, atol=1e-5), (
            name, float(val), float(ref[name]))

    print("KERNEL_OK")
</pallas_src>

<mosaic_0001>
module attributes {stable_mosaic.version = 11 : i64} {
  func.func @_fused_distill_kernel(%arg0: memref<64x16xf32, #tpu.memory_space<vmem>>, %arg1: memref<64x16xf32, #tpu.memory_space<vmem>>, %arg2: memref<16x128xf32, #tpu.memory_space<vmem>>, %arg3: memref<16x128xf32, #tpu.memory_space<vmem>>, %arg4: memref<4x128xf32, #tpu.memory_space<vmem>>, %arg5: memref<4x128xf32, #tpu.memory_space<vmem>>, %arg6: memref<2x128xf32, #tpu.memory_space<vmem>>, %arg7: memref<2x128xf32, #tpu.memory_space<vmem>>, %arg8: memref<1x128xf32, #tpu.memory_space<vmem>>) attributes {dimension_semantics = [], scalar_prefetch = 0 : i64, scratch_operands = 0 : i64, tpu.core_type = #tpu.core_type<tc>} {
    %c0 = arith.constant 0 : index
    %c0_0 = arith.constant 0 : index
    %0 = vector.load %arg0[%c0, %c0_0] : memref<64x16xf32, #tpu.memory_space<vmem>>, vector<64x16xf32>
    %c0_1 = arith.constant 0 : index
    %c0_2 = arith.constant 0 : index
    %1 = vector.load %arg1[%c0_1, %c0_2] : memref<64x16xf32, #tpu.memory_space<vmem>>, vector<64x16xf32>
    %cst = arith.constant 2.000000e+00 : f32
    %2 = vector.broadcast %cst : f32 to vector<64x16xf32>
    %3 = arith.divf %1, %2 : vector<64x16xf32>
    %cst_3 = arith.constant dense<0xFF800000> : vector<64xf32>
    %4 = vector.multi_reduction <maximumf>, %3, %cst_3 [1] : vector<64x16xf32> to vector<64xf32>
    %5 = vector.shape_cast %4 : vector<64xf32> to vector<64x1xf32>
    %6 = vector.broadcast %5 : vector<64x1xf32> to vector<64x16xf32>
    %7 = arith.subf %3, %6 : vector<64x16xf32>
    %8 = math.exp %7 : vector<64x16xf32>
    %cst_4 = arith.constant dense<0.000000e+00> : vector<64xf32>
    %9 = vector.multi_reduction <add>, %8, %cst_4 [1] : vector<64x16xf32> to vector<64xf32>
    %10 = vector.shape_cast %9 : vector<64xf32> to vector<64x1xf32>
    %11 = vector.broadcast %10 : vector<64x1xf32> to vector<64x16xf32>
    %12 = arith.divf %8, %11 : vector<64x16xf32>
    %cst_5 = arith.constant dense<0xFF800000> : vector<64xf32>
    %13 = vector.multi_reduction <maximumf>, %0, %cst_5 [1] : vector<64x16xf32> to vector<64xf32>
    %14 = vector.shape_cast %13 : vector<64xf32> to vector<64x1xf32>
    %15 = vector.broadcast %14 : vector<64x1xf32> to vector<64x16xf32>
    %16 = arith.subf %0, %15 : vector<64x16xf32>
    %17 = math.exp %16 : vector<64x16xf32>
    %cst_6 = arith.constant dense<0.000000e+00> : vector<64xf32>
    %18 = vector.multi_reduction <add>, %17, %cst_6 [1] : vector<64x16xf32> to vector<64xf32>
    %19 = vector.shape_cast %18 : vector<64xf32> to vector<64x1xf32>
    %20 = math.log %19 : vector<64x1xf32>
    %21 = vector.broadcast %20 : vector<64x1xf32> to vector<64x16xf32>
    %22 = arith.subf %16, %21 : vector<64x16xf32>
    %23 = arith.mulf %12, %22 : vector<64x16xf32>
    %24 = vector.shape_cast %23 : vector<64x16xf32> to vector<1x64x16xf32>
    %cst_7 = arith.constant dense<0.000000e+00> : vector<1xf32>
    %25 = vector.multi_reduction <add>, %24, %cst_7 [1, 2] : vector<1x64x16xf32> to vector<1xf32>
    %26 = vector.shape_cast %25 : vector<1xf32> to vector<1x1x1xf32>
    %27 = vector.extract %26[0, 0, 0] : f32 from vector<1x1x1xf32>
    %cst_8 = arith.constant 0.000000e+00 : f32
    %28 = arith.subf %cst_8, %27 : f32
    %cst_9 = arith.constant 7.812500e-03 : f32
    %29 = arith.mulf %28, %cst_9 : f32
    %c0_10 = arith.constant 0 : index
    %c0_11 = arith.constant 0 : index
    %30 = vector.load %arg2[%c0_10, %c0_11] : memref<16x128xf32, #tpu.memory_space<vmem>>, vector<16x128xf32>
    %c0_12 = arith.constant 0 : index
    %c0_13 = arith.constant 0 : index
    %31 = vector.load %arg3[%c0_12, %c0_13] : memref<16x128xf32, #tpu.memory_space<vmem>>, vector<16x128xf32>
    %32 = arith.negf %31 : vector<16x128xf32>
    %33 = math.exp %32 : vector<16x128xf32>
    %cst_14 = arith.constant 1.000000e+00 : f32
    %34 = vector.broadcast %cst_14 : f32 to vector<16x128xf32>
    %35 = arith.addf %34, %33 : vector<16x128xf32>
    %36 = arith.divf %34, %35 : vector<16x128xf32>
    %cst_15 = arith.constant 0.000000e+00 : f32
    %37 = vector.broadcast %cst_15 : f32 to vector<16x128xf32>
    %38 = arith.maximumf %30, %37 : vector<16x128xf32>
    %39 = arith.mulf %30, %36 : vector<16x128xf32>
    %40 = arith.subf %38, %39 : vector<16x128xf32>
    %41 = math.absf %30 : vector<16x128xf32>
    %cst_16 = arith.constant 0.000000e+00 : f32
    %42 = vector.broadcast %cst_16 : f32 to vector<16x128xf32>
    %43 = arith.subf %42, %41 : vector<16x128xf32>
    %44 = math.exp %43 : vector<16x128xf32>
    %45 = math.log1p %44 : vector<16x128xf32>
    %46 = arith.addf %40, %45 : vector<16x128xf32>
    %47 = vector.shape_cast %46 : vector<16x128xf32> to vector<1x16x128xf32>
    %cst_17 = arith.constant dense<0.000000e+00> : vector<1xf32>
    %48 = vector.multi_reduction <add>, %47, %cst_17 [1, 2] : vector<1x16x128xf32> to vector<1xf32>
    %49 = vector.shape_cast %48 : vector<1xf32> to vector<1x1x1xf32>
    %50 = vector.extract %49[0, 0, 0] : f32 from vector<1x1x1xf32>
    %cst_18 = arith.constant 4.88281257E-5 : f32
    %51 = arith.mulf %50, %cst_18 : f32
    %c0_19 = arith.constant 0 : index
    %c0_20 = arith.constant 0 : index
    %52 = vector.load %arg4[%c0_19, %c0_20] : memref<4x128xf32, #tpu.memory_space<vmem>>, vector<4x128xf32>
    %c0_21 = arith.constant 0 : index
    %c0_22 = arith.constant 0 : index
    %53 = vector.load %arg5[%c0_21, %c0_22] : memref<4x128xf32, #tpu.memory_space<vmem>>, vector<4x128xf32>
    %54 = arith.negf %53 : vector<4x128xf32>
    %55 = math.exp %54 : vector<4x128xf32>
    %cst_23 = arith.constant 1.000000e+00 : f32
    %56 = vector.broadcast %cst_23 : f32 to vector<4x128xf32>
    %57 = arith.addf %56, %55 : vector<4x128xf32>
    %58 = arith.divf %56, %57 : vector<4x128xf32>
    %cst_24 = arith.constant 0.000000e+00 : f32
    %59 = vector.broadcast %cst_24 : f32 to vector<4x128xf32>
    %60 = arith.maximumf %52, %59 : vector<4x128xf32>
    %61 = arith.mulf %52, %58 : vector<4x128xf32>
    %62 = arith.subf %60, %61 : vector<4x128xf32>
    %63 = math.absf %52 : vector<4x128xf32>
    %cst_25 = arith.constant 0.000000e+00 : f32
    %64 = vector.broadcast %cst_25 : f32 to vector<4x128xf32>
    %65 = arith.subf %64, %63 : vector<4x128xf32>
    %66 = math.exp %65 : vector<4x128xf32>
    %67 = math.log1p %66 : vector<4x128xf32>
    %68 = arith.addf %62, %67 : vector<4x128xf32>
    %69 = vector.shape_cast %68 : vector<4x128xf32> to vector<1x4x128xf32>
    %cst_26 = arith.constant dense<0.000000e+00> : vector<1xf32>
    %70 = vector.multi_reduction <add>, %69, %cst_26 [1, 2] : vector<1x4x128xf32> to vector<1xf32>
    %71 = vector.shape_cast %70 : vector<1xf32> to vector<1x1x1xf32>
    %72 = vector.extract %71[0, 0, 0] : f32 from vector<1x1x1xf32>
    %cst_27 = arith.constant 1.95312503E-4 : f32
    %73 = arith.mulf %72, %cst_27 : f32
    %c0_28 = arith.constant 0 : index
    %c0_29 = arith.constant 0 : index
    %74 = vector.load %arg6[%c0_28, %c0_29] : memref<2x128xf32, #tpu.memory_space<vmem>>, vector<2x128xf32>
    %c0_30 = arith.constant 0 : index
    %c0_31 = arith.constant 0 : index
    %75 = vector.load %arg7[%c0_30, %c0_31] : memref<2x128xf32, #tpu.memory_space<vmem>>, vector<2x128xf32>
    %76 = arith.negf %75 : vector<2x128xf32>
    %77 = math.exp %76 : vector<2x128xf32>
    %cst_32 = arith.constant 1.000000e+00 : f32
    %78 = vector.broadcast %cst_32 : f32 to vector<2x128xf32>
    %79 = arith.addf %78, %77 : vector<2x128xf32>
    %80 = arith.divf %78, %79 : vector<2x128xf32>
    %cst_33 = arith.constant 0.000000e+00 : f32
    %81 = vector.broadcast %cst_33 : f32 to vector<2x128xf32>
    %82 = arith.maximumf %74, %81 : vector<2x128xf32>
    %83 = arith.mulf %74, %80 : vector<2x128xf32>
    %84 = arith.subf %82, %83 : vector<2x128xf32>
    %85 = math.absf %74 : vector<2x128xf32>
    %cst_34 = arith.constant 0.000000e+00 : f32
    %86 = vector.broadcast %cst_34 : f32 to vector<2x128xf32>
    %87 = arith.subf %86, %85 : vector<2x128xf32>
    %88 = math.exp %87 : vector<2x128xf32>
    %89 = math.log1p %88 : vector<2x128xf32>
    %90 = arith.addf %84, %89 : vector<2x128xf32>
    %91 = tpu.iota {dimensions = array<i32: 0>} : vector<2x128xi32>
    %c128_i32 = arith.constant 128 : i32
    %92 = vector.broadcast %c128_i32 : i32 to vector<2x128xi32>
    %93 = arith.muli %91, %92 : vector<2x128xi32>
    %94 = tpu.iota {dimensions = array<i32: 1>} : vector<2x128xi32>
    %95 = arith.addi %93, %94 : vector<2x128xi32>
    %c210_i32 = arith.constant 210 : i32
    %96 = vector.broadcast %c210_i32 : i32 to vector<2x128xi32>
    %97 = arith.cmpi slt, %95, %96 : vector<2x128xi32>
    %cst_35 = arith.constant 0.000000e+00 : f32
    %98 = vector.broadcast %cst_35 : f32 to vector<2x128xf32>
    %99 = arith.select %97, %90, %98 : vector<2x128xi1>, vector<2x128xf32>
    %100 = vector.shape_cast %99 : vector<2x128xf32> to vector<1x2x128xf32>
    %cst_36 = arith.constant dense<0.000000e+00> : vector<1xf32>
    %101 = vector.multi_reduction <add>, %100, %cst_36 [1, 2] : vector<1x2x128xf32> to vector<1xf32>
    %102 = vector.shape_cast %101 : vector<1xf32> to vector<1x1x1xf32>
    %103 = vector.extract %102[0, 0, 0] : f32 from vector<1x1x1xf32>
    %cst_37 = arith.constant 4.76190471E-4 : f32
    %104 = arith.mulf %103, %cst_37 : f32
    %105 = tpu.iota {dimensions = array<i32: 1>} : vector<1x128xi32>
    %c0_i32 = arith.constant 0 : i32
    %106 = vector.broadcast %c0_i32 : i32 to vector<1x128xi32>
    %107 = arith.cmpi eq, %105, %106 : vector<1x128xi32>
    %cst_38 = arith.constant 0.000000e+00 : f32
    %108 = vector.broadcast %cst_38 : f32 to vector<1x128xf32>
    %109 = vector.broadcast %29 : f32 to vector<1x128xf32>
    %110 = arith.select %107, %109, %108 : vector<1x128xi1>, vector<1x128xf32>
    %c1_i32 = arith.constant 1 : i32
    %111 = vector.broadcast %c1_i32 : i32 to vector<1x128xi32>
    %112 = arith.cmpi eq, %105, %111 : vector<1x128xi32>
    %113 = vector.broadcast %51 : f32 to vector<1x128xf32>
    %114 = arith.select %112, %113, %110 : vector<1x128xi1>, vector<1x128xf32>
    %c2_i32 = arith.constant 2 : i32
    %115 = vector.broadcast %c2_i32 : i32 to vector<1x128xi32>
    %116 = arith.cmpi eq, %105, %115 : vector<1x128xi32>
    %117 = vector.broadcast %73 : f32 to vector<1x128xf32>
    %118 = arith.select %116, %117, %114 : vector<1x128xi1>, vector<1x128xf32>
    %c3_i32 = arith.constant 3 : i32
    %119 = vector.broadcast %c3_i32 : i32 to vector<1x128xi32>
    %120 = arith.cmpi eq, %105, %119 : vector<1x128xi32>
    %121 = vector.broadcast %104 : f32 to vector<1x128xf32>
    %122 = arith.select %120, %121, %118 : vector<1x128xi1>, vector<1x128xf32>
    %c0_39 = arith.constant 0 : index
    %c0_40 = arith.constant 0 : index
    %123 = vector.load %arg8[%c0_39, %c0_40] : memref<1x128xf32, #tpu.memory_space<vmem>>, vector<1x128xf32>
    tpu.vector_store %arg8[%c0_39, %c0_40], %122 {strides = array<i32>} : memref<1x128xf32, #tpu.memory_space<vmem>>, vector<1x128xf32>,
    return
  }
}

</mosaic_0001>

<bundles_post_ra>
// kernel: tpu_custom_call.1
= control target key start
LH: loop header
LB: loop body
LE: loop exit
PB: predicated region body
PF: predicated region fallthrough
CT: control target
= control target key end

     0   :  { %vm55_vm0 = vcmask 130048   ;;  %s873_s0 = inlined_call_operand.vmem [shape: f32[64,16], index: 0, kind: input, shape index: {}]   ;;  %s874_s1 = inlined_call_operand.vmem [shape: f32[64,16], index: 1, kind: input, shape index: {}]   ;;  %s875_s2 = inlined_call_operand.vmem [shape: f32[16,128], index: 2, kind: input, shape index: {}]   ;;  %s876_s3 = inlined_call_operand.vmem [shape: f32[16,128], index: 3, kind: input, shape index: {}]   ;;  %s877_s4 = inlined_call_operand.vmem [shape: f32[4,128], index: 4, kind: input, shape index: {}]   ;;  %s878_s5 = inlined_call_operand.vmem [shape: f32[4,128], index: 5, kind: input, shape index: {}]   ;;  %s879_s6 = inlined_call_operand.vmem [shape: f32[2,128], index: 6, kind: input, shape index: {}]   ;;  %s880_s7 = inlined_call_operand.vmem [shape: f32[2,128], index: 7, kind: input, shape index: {}]   ;;  %s881_s8 = inlined_call_operand.hbm [shape: f32[1,128], index: 8, kind: output, shape index: {}]  }
   0x1   :  { %v30_v0 = vld [vmem:[%s873_s0] sm:$0xff]  ;;  %v31_v2 = vld [vmem:[%s873_s0 + $0x8] sm:$0xff]  ;;  %v40_v7 = vld [vmem:[%s874_s1 + $0x10] sm:$0xff] }
   0x2   :  { %v38_v1 = vld [vmem:[%s874_s1] sm:$0xff]  ;;  %v144_v3 = vsel %vm55_vm0, %v30_v0, -inf  ;;  %v39_v5 = vld [vmem:[%s874_s1 + $0x8] sm:$0xff]  ;;  %v147_v9 = vsel %vm55_vm0, %v31_v2, -inf  ;;  %v32_v10 = vld [vmem:[%s873_s0 + $0x10] sm:$0xff]  ;;  %v646_v12 = vmul.f32 0.5, %v40_v7 }
   0x3   :  { %v631_v4 = vmul.f32 0.5, %v38_v1  ;;  %145 = vmax.xlane.f32.xlu0 %v144_v3  ;;  %v48_v6 = vmul.f32 0.5, %v39_v5  ;;  %v41_v13 = vld [vmem:[%s874_s1 + $0x18] sm:$0xff] }
   0x5   :  { %v56_v8 = vsel %vm55_vm0, %v631_v4, -inf  ;;  %v59_v11 = vsel %vm55_vm0, %v48_v6, -inf }
   0x6   :  { %57 = vmax.xlane.f32.xlu1 %v56_v8 }
   0x7   :  { %148 = vmax.xlane.f32.xlu0 %v147_v9 }
   0x8   :  { %13 = vsyncpa [#allocation3], 0  ;;  %v150_v14 = vsel %vm55_vm0, %v32_v10, -inf  ;;  %v33_v15 = vld [vmem:[%s873_s0 + $0x18] sm:$0xff]  ;;  %v62_v16 = vsel %vm55_vm0, %v646_v12, -inf  ;;  %v657_v17 = vmul.f32 0.5, %v41_v13 }
   0x9   :  { %v42_v18 = vld [vmem:[%s874_s1 + $0x20] sm:$0xff]  ;;  %v153_v19 = vsel %vm55_vm0, %v33_v15, -inf  ;;  %v43_v23 = vld [vmem:[%s874_s1 + $0x28] sm:$0xff]  ;;  %v44_v28 = vld [vmem:[%s874_s1 + $0x30] sm:$0xff]  ;;  %vm405_vm4 = vcmask 1041408   ;;  %vm360_vm7 = vcmask 1043456  }
   0xa   :  { %60 = vmax.xlane.f32.xlu1 %v59_v11  ;;  %v34_v20 = vld [vmem:[%s873_s0 + $0x20] sm:$0xff]  ;;  %v65_v21 = vsel %vm55_vm0, %v657_v17, -inf  ;;  %v668_v22 = vmul.f32 0.5, %v42_v18  ;;  %v677_v25 = vld [vmem:[%s873_s0 + $0x28] sm:$0xff]  ;;  %v681_v27 = vmul.f32 0.5, %v43_v23  ;;  %v691_v30 = vld [vmem:[%s873_s0 + $0x30] sm:$0xff] }
   0xb   :  { %151 = vmax.xlane.f32.xlu0 %v150_v14  ;;  %v156_v24 = vsel %vm55_vm0, %v34_v20, -inf  ;;  %v159_v29 = vsel %vm55_vm0, %v677_v25, -inf  ;;  %v695_v32 = vmul.f32 0.5, %v44_v28  ;;  %v45_v33 = vld [vmem:[%s874_s1 + $0x38] sm:$0xff]  ;;  %v162_v34 = vsel %vm55_vm0, %v691_v30, -inf  ;;  %s575_s29 = smov [#allocation2]  }
   0xc   :  { %v68_v26 = vsel %vm55_vm0, %v668_v22, -inf  ;;  %v71_v31 = vsel %vm55_vm0, %v681_v27, -inf  ;;  %v705_v35 = vld [vmem:[%s873_s0 + $0x38] sm:$0xff]  ;;  %v709_v37 = vmul.f32 0.5, %v45_v33  ;;  %s436_s30 = sshll.u32 %s575_s29, 4  ;;  %s437_s30 = int_to_ptr.vmem [resolvable:$true] %s436_s30 }
   0xd   :  { %v74_v36 = vsel %vm55_vm0, %v695_v32, -inf  ;;  %v165_v38 = vsel %vm55_vm0, %v705_v35, -inf  ;;  %s553_s12 = scalar_lea.vmem %s437_s30, 16  ;;  %s557_s13 = scalar_lea.vmem %s437_s30, 32 }
   0xe   :  { %63 = vmax.xlane.f32.xlu1 %v62_v16  ;;  %v77_v39 = vsel %vm55_vm0, %v709_v37, -inf  ;;  %p554_p0 = scmp.ne.s32.totalorder %s437_s30, %s553_s12  ;;  %p558_p1 = scmp.lt.s32.totalorder %s437_s30, %s437_s30 }
   0xf   :  { %154 = vmax.xlane.f32.xlu0 %v153_v19  ;;  %p559_p2 = scmp.lt.s32.totalorder %s557_s13, %s553_s12 }
  0x11   :  { %p560_p3 = por %p559_p2, %p558_p1 }
  0x12   :  { %66 = vmax.xlane.f32.xlu1 %v65_v21 }
  0x13   :  { %157 = vmax.xlane.f32.xlu0 %v156_v24  ;;  %p561_p4 = pnand %p560_p3, %p554_p0 }
  0x16   :  { %69 = vmax.xlane.f32.xlu1 %v68_v26 }
  0x17   :  { %160 = vmax.xlane.f32.xlu0 %v159_v29 }
  0x1a   :  { %72 = vmax.xlane.f32.xlu1 %v71_v31 }
  0x1b   :  { %163 = vmax.xlane.f32.xlu0 %v162_v34 }
  0x1e   :  { %75 = vmax.xlane.f32.xlu1 %v74_v36 }
  0x1f   :  { %166 = vmax.xlane.f32.xlu0 %v165_v38 }
  0x22   :  { %78 = vmax.xlane.f32.xlu1 %v77_v39 }
  0x8c   :  { %v146_v40 = vpop.xlane.xlu0 %145 }
  0x8d   :  { %v715_v41 = vsub.f32 %v30_v0, %v146_v40 }
  0x8f   :  { %v58_v42 = vpop.xlane.xlu1 %57  ;;  %v176_v43 = vmul.f32 1.442695, %v715_v41 }
  0x90   :  { %v149_v44 = vpop.xlane.xlu0 %148  ;;  %v80_v58 = vsub.f32 %v631_v4, %v58_v42 }
  0x91   :  { %457 = vpow2.f32 %v176_v43  ;;  %v718_v45 = vsub.f32 %v31_v2, %v149_v44  ;;  %v775_v44 = vld [vmem:[%s875_s2] sm:$0xff] }
  0x92   :  { %v88_v2 = vmul.f32 1.442695, %v80_v58 }
  0x93   :  { %v61_v46 = vpop.xlane.xlu1 %60  ;;  %v178_v47 = vmul.f32 1.442695, %v718_v45 }
  0x94   :  { %v81_v48 = vsub.f32 %v48_v6, %v61_v46  ;;  %v152_v49 = vpop.xlane.xlu0 %151  ;;  %v780_v46 = vld [vmem:[%s875_s2 + $0x8] sm:$0xff] }
  0x95   :  { %459 = vpow2.f32 %v178_v47  ;;  %v721_v51 = vsub.f32 %v32_v10, %v152_v49  ;;  %v297_v49 = vand.u32 2147483647, %v780_v46 }
  0x96   :  { %v90_v50 = vmul.f32 1.442695, %v81_v48  ;;  %v296_v48 = vand.u32 2147483647, %v775_v44 }
  0x97   :  { %v64_v52 = vpop.xlane.xlu1 %63  ;;  %v180_v53 = vmul.f32 1.442695, %v721_v51 }
  0x98   :  { %461 = vpow2.f32 %v90_v50  ;;  %v82_v54 = vsub.f32 %v646_v12, %v64_v52  ;;  %v155_v55 = vpop.xlane.xlu0 %154 }
  0x99   :  { %463 = vpow2.f32 %v180_v53  ;;  %v725_v57 = vsub.f32 %v33_v15, %v155_v55  ;;  %v276_v53 = vld [vmem:[%s876_s3] sm:$0xff]  ;;  %v298_v55 = vsub.f32 0.0, %v296_v48 }
  0x9a   :  { %v92_v56 = vmul.f32 1.442695, %v82_v54  ;;  %v277_v54 = vld [vmem:[%s876_s3 + $0x8] sm:$0xff] }
  0x9b   :  { %v67_v59 = vpop.xlane.xlu1 %66  ;;  %v182_v60 = vmul.f32 1.442695, %v725_v57 }
  0x9c   :  { %465 = vpow2.f32 %v92_v56  ;;  %v83_v61 = vsub.f32 %v657_v17, %v67_v59  ;;  %v158_v62 = vpop.xlane.xlu0 %157  ;;  %v299_v56 = vsub.f32 0.0, %v297_v49 }
  0x9d   :  { %467 = vpow2.f32 %v182_v60  ;;  %v730_v0 = vsub.f32 %v34_v20, %v158_v62  ;;  %v444_v60 = vmul.f32 -1.442695, %v276_v53 }
  0x9e   :  { %v94_v63 = vmul.f32 1.442695, %v83_v61  ;;  %v458_v1 = vpop.eup %457  ;;  %v445_v61 = vmul.f32 -1.442695, %v277_v54 }
  0x9f   :  { %v70_v3 = vpop.xlane.xlu1 %69  ;;  %v184_v5 = vmul.f32 1.442695, %v730_v0  ;;  %v192_v4 = vsel %vm55_vm0, %v458_v1, 0.0  ;;  %v302_v1 = vmul.f32 1.442695, %v299_v56 }
  0xa0   :  { %469 = vpow2.f32 %v94_v63  ;;  %v84_v6 = vsub.f32 %v668_v22, %v70_v3  ;;  %193 = vadd.xlane.f32.xlu0 %v192_v4  ;;  %v161_v7 = vpop.xlane.xlu0 %160  ;;  %v300_v63 = vmul.f32 1.442695, %v298_v55  ;;  %v373_v4 = vld [vmem:[%s880_s7] sm:$0x3] }
  0xa1   :  { %471 = vpow2.f32 %v184_v5  ;;  %v736_v9 = vsub.f32 %v677_v25, %v161_v7 }
  0xa2   :  { %v96_v8 = vmul.f32 1.442695, %v84_v6  ;;  %v460_v10 = vpop.eup %459  ;;  %473 = vpow2.f32 %v88_v2  ;;  %v800_v2 = vld [vmem:[%s879_s6] sm:$0x3] }
  0xa3   :  { %v73_v11 = vpop.xlane.xlu1 %72  ;;  %v195_v13 = vsel %vm55_vm0, %v460_v10, 0.0  ;;  %v186_v14 = vmul.f32 1.442695, %v736_v9  ;;  %v383_v3 = vand.u32 2147483647, %v800_v2 }
  0xa4   :  { %475 = vpow2.f32 %v96_v8  ;;  %v85_v12 = vsub.f32 %v681_v27, %v73_v11  ;;  %196 = vadd.xlane.f32.xlu1 %v195_v13  ;;  %v164_v16 = vpop.xlane.xlu0 %163  ;;  %v447_v8 = vmul.f32 -1.442695, %v373_v4 }
  0xa5   :  { %v741_v15 = vpop.eup %461  ;;  %477 = vpow2.f32 %v186_v14  ;;  %v746_v19 = vsub.f32 %v691_v30, %v164_v16  ;;  %v384_v10 = vsub.f32 0.0, %v383_v3 }
  0xa6   :  { %v98_v17 = vmul.f32 1.442695, %v85_v12  ;;  %v107_v18 = vsel %vm55_vm0, %v741_v15, 0.0  ;;  %v464_v20 = vpop.eup %463 }
  0xa7   :  { %v76_v21 = vpop.xlane.xlu1 %75  ;;  %v198_v23 = vsel %vm55_vm0, %v464_v20, 0.0  ;;  %v188_v24 = vmul.f32 1.442695, %v746_v19  ;;  %v385_v12 = vmul.f32 1.442695, %v384_v10 }
  0xa8   :  { %479 = vpow2.f32 %v98_v17  ;;  %v86_v22 = vsub.f32 %v695_v32, %v76_v21  ;;  %108 = vadd.xlane.f32.xlu1 %v107_v18  ;;  %199 = vadd.xlane.f32.xlu0 %v198_v23  ;;  %v167_v26 = vpop.xlane.xlu0 %166 }
  0xa9   :  { %v751_v25 = vpop.eup %465  ;;  %481 = vpow2.f32 %v188_v24  ;;  %v756_v29 = vsub.f32 %v705_v35, %v167_v26 }
  0xaa   :  { %v100_v27 = vmul.f32 1.442695, %v86_v22  ;;  %v110_v28 = vsel %vm55_vm0, %v751_v25, 0.0  ;;  %v468_v30 = vpop.eup %467 }
  0xab   :  { %v79_v31 = vpop.xlane.xlu1 %78  ;;  %v201_v33 = vsel %vm55_vm0, %v468_v30, 0.0  ;;  %v190_v34 = vmul.f32 1.442695, %v756_v29 }
  0xac   :  { %483 = vpow2.f32 %v100_v27  ;;  %v87_v32 = vsub.f32 %v709_v37, %v79_v31  ;;  %111 = vadd.xlane.f32.xlu1 %v110_v28  ;;  %202 = vadd.xlane.f32.xlu0 %v201_v33 }
  0xad   :  { %v761_v36 = vpop.eup %469  ;;  %485 = vpow2.f32 %v190_v34 }
  0xae   :  { %v102_v38 = vmul.f32 1.442695, %v87_v32  ;;  %v113_v39 = vsel %vm55_vm0, %v761_v36, 0.0  ;;  %v472_v35 = vpop.eup %471 }
  0xaf   :  { %v765_v40 = vpop.eup %473  ;;  %v204_v42 = vsel %vm55_vm0, %v472_v35, 0.0 }
  0xb0   :  { %487 = vpow2.f32 %v102_v38  ;;  %114 = vadd.xlane.f32.xlu1 %v113_v39  ;;  %205 = vadd.xlane.f32.xlu0 %v204_v42  ;;  %v104_v50 = vsel %vm55_vm0, %v765_v40, 0.0  ;;  %v290_v42 = vmax.f32 %v775_v44, 0.0 }
  0xb1   :  { %v768_v37 = vpop.eup %475  ;;  %489 = vpow2.f32 %v444_v60 }
  0xb2   :  { %v116_v43 = vsel %vm55_vm0, %v768_v37, 0.0  ;;  %v478_v47 = vpop.eup %477  ;;  %491 = vpow2.f32 %v445_v61 }
  0xb3   :  { %v207_v59 = vsel %vm55_vm0, %v478_v47, 0.0  ;;  %493 = vpow2.f32 %v300_v63 }
  0xb4   :  { %117 = vadd.xlane.f32.xlu1 %v116_v43  ;;  %105 = vadd.xlane.f32.xlu0 %v104_v50  ;;  %495 = vpow2.f32 %v302_v1  ;;  %v291_v43 = vmax.f32 %v780_v46, 0.0  ;;  %v397_v1 = vlaneseq }
  0xb5   :  { %v786_v52 = vpop.eup %479  ;;  %497 = vpow2.f32 %v447_v8 }
  0xb6   :  { %v119_v58 = vsel %vm55_vm0, %v786_v52, 0.0  ;;  %v482_v62 = vpop.eup %481  ;;  %499 = vpow2.f32 %v385_v12 }
  0xb7   :  { %v210_v6 = vsel %vm55_vm0, %v482_v62, 0.0 }
  0xb8   :  { %120 = vadd.xlane.f32.xlu1 %v119_v58  ;;  %208 = vadd.xlane.f32.xlu0 %v207_v59 }
  0xb9   :  { %v803_v5 = vpop.eup %483 }
  0xba   :  { %v122_v7 = vsel %vm55_vm0, %v803_v5, 0.0  ;;  %v486_v11 = vpop.eup %485 }
  0xbb   :  { %v213_v16 = vsel %vm55_vm0, %v486_v11, 0.0  ;;  %v398_v11 = vshrl.u32 %v397_v1, 7 }
  0xbc   :  { %123 = vadd.xlane.f32.xlu1 %v122_v7  ;;  %211 = vadd.xlane.f32.xlu0 %v210_v6 }
  0xbd   :  { %v811_v13 = vpop.eup %487 }
  0xbe   :  { %v125_v14 = vsel %vm55_vm0, %v811_v13, 0.0  ;;  %v490_v17 = vpop.eup %489 }
  0xbf   :  { %v492_v18 = vpop.eup %491  ;;  %v284_v20 = vadd.f32 1.0, %v490_v17 }
  0xc0   :  { %126 = vadd.xlane.f32.xlu1 %v125_v14  ;;  %214 = vadd.xlane.f32.xlu0 %v213_v16  ;;  %v494_v21 = vpop.eup %493  ;;  %v285_v22 = vadd.f32 1.0, %v492_v18  ;;  %v399_v18 = vmul.u32 128, %v398_v11 }
  0xc1   :  { %v496_v23 = vpop.eup %495  ;;  %501 = vrcp.f32 %v284_v20  ;;  %v304_v24 = vadd.f32 1.0, %v494_v21  ;;  %v307_v32 = vmul.f32 -0.5, %v494_v21  ;;  %v310_v48 = vand.u32 2147483647, %v494_v21 }
  0xc2   :  { %v498_v26 = vpop.eup %497  ;;  %503 = vrcp.f32 %v285_v22  ;;  %v313_v27 = vadd.f32 1.0, %v496_v23  ;;  %v316_v33 = vmul.f32 -0.5, %v496_v23  ;;  %v319_v55 = vand.u32 2147483647, %v496_v23 }
  0xc3   :  { %505 = vlog2.f32 %v304_v24  ;;  %v377_v28 = vadd.f32 1.0, %v498_v26  ;;  %v500_v30 = vpop.eup %499  ;;  %v308_v38 = vadd.f32 1.0, %v307_v32  ;;  %vm311_vm1 = vcmp.lt.f32.partialorder %v310_v48, 0.0004427343 }
  0xc4   :  { %507 = vlog2.f32 %v313_v27  ;;  %v387_v31 = vadd.f32 1.0, %v500_v30  ;;  %v317_v39 = vadd.f32 1.0, %v316_v33  ;;  %v390_v60 = vmul.f32 -0.5, %v500_v30  ;;  %v828_v27 = vld [vmem:[%s877_s4] sm:$0xf] }
  0xc5   :  { %509 = vrcp.f32 %v377_v28  ;;  %v309_v53 = vmul.f32 %v494_v21, %v308_v38  ;;  %vm320_vm2 = vcmp.lt.f32.partialorder %v319_v55, 0.0004427343  ;;  %v393_v10 = vand.u32 2147483647, %v500_v30 }
  0xc6   :  { %511 = vlog2.f32 %v387_v31  ;;  %v318_v54 = vmul.f32 %v496_v23, %v317_v39  ;;  %v391_v4 = vadd.f32 1.0, %v390_v60  ;;  %v822_v20 = vand.u32 127, %v397_v1 }
  0xc7   :  { %vm394_vm3 = vcmp.lt.f32.partialorder %v393_v10, 0.0004427343  ;;  %v346_v28 = vand.u32 2147483647, %v828_v27 }
  0xc8   :  { %v392_v17 = vmul.f32 %v500_v30, %v391_v4  ;;  %v402_v24 = vadd.s32 %v822_v20, %v399_v18  ;;  %v336_v30 = vld [vmem:[%s878_s5] sm:$0xf]  ;;  %vm417_vm8 = vcmp.eq.s32.totalorder %v822_v20, 0  ;;  %vm420_vm9 = vcmp.eq.s32.totalorder %v822_v20, 1 }
  0xc9   :  { %v347_v31 = vsub.f32 0.0, %v346_v28  ;;  %vm423_vm10 = vcmp.eq.s32.totalorder %v822_v20, 2  ;;  %vm426_vm11 = vcmp.eq.s32.totalorder %v822_v20, 3 }
  0xca   :  { %vm403_vm5 = vcmp.lt.s32.totalorder %v402_v24, 210 }
  0xcb   :  { %v348_v38 = vmul.f32 1.442695, %v347_v31 }
  0xce   :  { %v502_v34 = vpop.eup %501 }
  0xcf   :  { %v504_v35 = vpop.eup %503  ;;  %v292_v47 = vmul.f32 %v502_v34, %v775_v44  ;;  %v380_v44 = vmax.f32 %v800_v2, 0.0  ;;  %v446_v34 = vmul.f32 -1.442695, %v336_v30 }
  0xd0   :  { %v506_v49 = vpop.eup %505  ;;  %v293_v50 = vmul.f32 %v504_v35, %v780_v46 }
  0xd1   :  { %v508_v56 = vpop.eup %507  ;;  %v294_v58 = vsub.f32 %v290_v42, %v292_v47  ;;  %v306_v59 = vmul.f32 0.6931472, %v506_v49  ;;  %513 = vpow2.f32 %v446_v34 }
  0xd2   :  { %v510_v61 = vpop.eup %509  ;;  %v295_v62 = vsub.f32 %v291_v43, %v293_v50  ;;  %v315_v63 = vmul.f32 0.6931472, %v508_v56  ;;  %515 = vpow2.f32 %v348_v38 }
  0xd3   :  { %v312_v3 = vsel %vm311_vm1, %v309_v53, %v306_v59  ;;  %v381_v6 = vmul.f32 %v510_v61, %v800_v2  ;;  %v512_v46 = vpop.eup %511 }
  0xd4   :  { %v321_v7 = vsel %vm320_vm2, %v318_v54, %v315_v63  ;;  %v322_v8 = vadd.f32 %v312_v3, %v294_v58  ;;  %v389_v16 = vmul.f32 0.6931472, %v512_v46 }
  0xd5   :  { %v323_v12 = vadd.f32 %v321_v7, %v295_v62  ;;  %v382_v14 = vsub.f32 %v380_v44, %v381_v6 }
  0xd6   :  { %v395_v22 = vsel %vm394_vm3, %v392_v17, %v389_v16 }
  0xd7   :  { %v324_v21 = vadd.f32 %v323_v12, %v322_v8  ;;  %v396_v23 = vadd.f32 %v395_v22, %v382_v14 }
  0xd9   :  { %325 = vadd.xlane.f32.xlu1 %v324_v21  ;;  %v404_v2 = vsel %vm403_vm5, %v396_v23, 0.0 }
  0xda   :  { %v406_v26 = vsel %vm405_vm4, %v404_v2, 0.0 }
  0xdd   :  { %407 = vadd.xlane.f32.xlu1 %v406_v26 }
  0xde   :  { %v514_v53 = vpop.eup %513 }
  0xdf   :  { %v834_v54 = vpop.eup %515  ;;  %v340_v58 = vadd.f32 1.0, %v514_v53 }
  0xe0   :  { %v350_v61 = vadd.f32 1.0, %v834_v54 }
 0x129   :  { %v194_v32 = vpop.xlane.xlu0 %193 }
 0x12d   :  { %v197_v33 = vpop.xlane.xlu1 %196 }
 0x12e   :  { %517 = vlog2.f32 %v197_v33 }
 0x12f   :  { %519 = vlog2.f32 %v194_v32 }
 0x131   :  { %v109_v39 = vpop.xlane.xlu1 %108  ;;  %v200_v35 = vpop.xlane.xlu0 %199 }
 0x132   :  { %521 = vrcp.f32 %v109_v39 }
 0x133   :  { %523 = vlog2.f32 %v200_v35 }
 0x135   :  { %v112_v42 = vpop.xlane.xlu1 %111  ;;  %v203_v43 = vpop.xlane.xlu0 %202 }
 0x136   :  { %525 = vrcp.f32 %v112_v42 }
 0x137   :  { %527 = vlog2.f32 %v203_v43 }
 0x139   :  { %v115_v47 = vpop.xlane.xlu1 %114  ;;  %v206_v48 = vpop.xlane.xlu0 %205 }
 0x13a   :  { %529 = vrcp.f32 %v115_v47 }
 0x13b   :  { %531 = vlog2.f32 %v206_v48  ;;  %v518_v59 = vpop.eup %517 }
 0x13c   :  { %v520_v60 = vpop.eup %519  ;;  %v219_v44 = vmul.f32 0.6931472, %v518_v59 }
 0x13d   :  { %v118_v49 = vpop.xlane.xlu1 %117  ;;  %v106_v50 = vpop.xlane.xlu0 %105  ;;  %v217_v46 = vmul.f32 0.6931472, %v520_v60  ;;  %v343_v60 = vmax.f32 %v828_v27, 0.0 }
 0x13e   :  { %533 = vrcp.f32 %v118_v49  ;;  %v233_v16 = vsub.f32 %v718_v45, %v219_v44 }
 0x13f   :  { %535 = vrcp.f32 %v106_v50  ;;  %v522_v62 = vpop.eup %521  ;;  %v232_v23 = vsub.f32 %v715_v41, %v217_v46  ;;  %v353_v41 = vmul.f32 -0.5, %v834_v54 }
 0x140   :  { %v524_v3 = vpop.eup %523  ;;  %v131_v7 = vmul.f32 %v522_v62, %v741_v15 }
 0x141   :  { %v121_v55 = vpop.xlane.xlu1 %120  ;;  %v209_v56 = vpop.xlane.xlu0 %208  ;;  %v221_v10 = vmul.f32 0.6931472, %v524_v3  ;;  %v354_v50 = vadd.f32 1.0, %v353_v41 }
 0x142   :  { %537 = vrcp.f32 %v121_v55  ;;  %v241_v24 = vmul.f32 %v233_v16, %v131_v7 }
 0x143   :  { %539 = vlog2.f32 %v209_v56  ;;  %v526_v6 = vpop.eup %525  ;;  %v234_v15 = vsub.f32 %v721_v51, %v221_v10 }
 0x144   :  { %541 = vrcp.f32 %v340_v58  ;;  %v528_v4 = vpop.eup %527  ;;  %v133_v18 = vmul.f32 %v526_v6, %v751_v25  ;;  %v249_v34 = vsel %vm55_vm0, %v241_v24, 0.0  ;;  %v356_v58 = vand.u32 2147483647, %v834_v54 }
 0x145   :  { %v124_v63 = vpop.xlane.xlu1 %123  ;;  %v212_v1 = vpop.xlane.xlu0 %211  ;;  %v223_v21 = vmul.f32 0.6931472, %v528_v4  ;;  %v355_v6 = vmul.f32 %v834_v54, %v354_v50 }
 0x146   :  { %543 = vrcp.f32 %v124_v63  ;;  %v242_v25 = vmul.f32 %v234_v15, %v133_v18  ;;  %vm357_vm6 = vcmp.lt.f32.partialorder %v356_v58, 0.0004427343 }
 0x147   :  { %545 = vlog2.f32 %v212_v1  ;;  %v530_v8 = vpop.eup %529  ;;  %v235_v45 = vsub.f32 %v725_v57, %v223_v21 }
 0x148   :  { %547 = vlog2.f32 %v350_v61  ;;  %v532_v14 = vpop.eup %531  ;;  %v135_v28 = vmul.f32 %v530_v8, %v761_v36  ;;  %v251_v47 = vsel %vm55_vm0, %v242_v25, 0.0 }
 0x149   :  { %v127_v11 = vpop.xlane.xlu1 %126  ;;  %v215_v12 = vpop.xlane.xlu0 %214  ;;  %v225_v2 = vmul.f32 0.6931472, %v532_v14 }
 0x14a   :  { %549 = vrcp.f32 %v127_v11  ;;  %v243_v39 = vmul.f32 %v235_v45, %v135_v28 }
 0x14b   :  { %v534_v17 = vpop.eup %533  ;;  %551 = vlog2.f32 %v215_v12  ;;  %v236_v38 = vsub.f32 %v730_v0, %v225_v2 }
 0x14c   :  { %v536_v22 = vpop.eup %535  ;;  %v137_v31 = vmul.f32 %v534_v17, %v768_v37  ;;  %v253_v56 = vsel %vm55_vm0, %v243_v39, 0.0 }
 0x14d   :  { %v129_v26 = vmul.f32 %v536_v22, %v765_v40 }
 0x14e   :  { %v244_v43 = vmul.f32 %v236_v38, %v137_v31 }
 0x14f   :  { %v538_v30 = vpop.eup %537  ;;  %v240_v32 = vmul.f32 %v232_v23, %v129_v26 }
 0x150   :  { %v540_v33 = vpop.eup %539  ;;  %v139_v57 = vmul.f32 %v538_v30, %v786_v52  ;;  %v255_v62 = vsel %vm55_vm0, %v244_v43, 0.0 }
 0x151   :  { %v227_v51 = vmul.f32 0.6931472, %v540_v33  ;;  %v248_v40 = vsel %vm55_vm0, %v240_v32, 0.0  ;;  %v542_v35 = vpop.eup %541 }
 0x152   :  { %v250_v36 = vadd.f32 %v249_v34, %v248_v40  ;;  %v344_v63 = vmul.f32 %v542_v35, %v828_v27 }
 0x153   :  { %v544_v42 = vpop.eup %543  ;;  %v237_v37 = vsub.f32 %v736_v9, %v227_v51 }
 0x154   :  { %v546_v48 = vpop.eup %545  ;;  %v252_v49 = vadd.f32 %v251_v47, %v250_v36  ;;  %v141_v9 = vmul.f32 %v544_v42, %v803_v5  ;;  %v345_v11 = vsub.f32 %v343_v60, %v344_v63 }
 0x155   :  { %v548_v53 = vpop.eup %547  ;;  %v245_v55 = vmul.f32 %v237_v37, %v139_v57  ;;  %v229_v0 = vmul.f32 0.6931472, %v546_v48 }
 0x156   :  { %v254_v59 = vadd.f32 %v253_v56, %v252_v49  ;;  %v352_v44 = vmul.f32 0.6931472, %v548_v53 }
 0x157   :  { %v550_v61 = vpop.eup %549  ;;  %v238_v52 = vsub.f32 %v746_v19, %v229_v0  ;;  %v257_v7 = vsel %vm55_vm0, %v245_v55, 0.0 }
 0x158   :  { %v552_v1 = vpop.eup %551  ;;  %v256_v3 = vadd.f32 %v255_v62, %v254_v59  ;;  %v143_v19 = vmul.f32 %v550_v61, %v811_v13  ;;  %v358_v12 = vsel %vm357_vm6, %v355_v6, %v352_v44 }
 0x159   :  { %v231_v4 = vmul.f32 0.6931472, %v552_v1  ;;  %v246_v46 = vmul.f32 %v238_v52, %v141_v9  ;;  %v359_v17 = vadd.f32 %v358_v12, %v345_v11 }
 0x15a   :  { %v258_v8 = vadd.f32 %v257_v7, %v256_v3 }
 0x15b   :  { %v239_v10 = vsub.f32 %v756_v29, %v231_v4  ;;  %v259_v5 = vsel %vm55_vm0, %v246_v46, 0.0  ;;  %v361_v18 = vsel %vm360_vm7, %v359_v17, 0.0 }
 0x15c   :  { %v260_v14 = vadd.f32 %v259_v5, %v258_v8 }
 0x15d   :  { %v247_v27 = vmul.f32 %v239_v10, %v143_v19 }
 0x15f   :  { %v261_v16 = vsel %vm55_vm0, %v247_v27, 0.0 }
 0x160   :  { %v262_v54 = vadd.f32 %v261_v16, %v260_v14 }
 0x162   :  { %263 = vadd.xlane.f32.xlu0 %v262_v54  ;;  %v326_v21 = vpop.xlane.xlu1 %325 }
 0x163   :  { %v327_v22 = vrot.slane %v326_v21, 4 }
 0x165   :  { %v328_v29 = vadd.f32 %v327_v22, %v326_v21 }
 0x166   :  { %362 = vadd.xlane.f32.xlu0 %v361_v18  ;;  %v408_v23 = vpop.xlane.xlu1 %407 }
 0x167   :  { %v409_v24 = vrot.slane %v408_v23, 4  ;;  %v329_v13 = vrot.slane %v328_v29, 2 }
 0x169   :  { %v410_v15 = vadd.f32 %v409_v24, %v408_v23  ;;  %v330_v31 = vadd.f32 %v329_v13, %v328_v29 }
 0x16b   :  { %v411_v30 = vrot.slane %v410_v15, 2  ;;  %v331_v38 = vrot.slane %v330_v31, 1 }
 0x16d   :  { %v412_v41 = vadd.f32 %v411_v30, %v410_v15  ;;  %v332_v36 = vadd.f32 %v331_v38, %v330_v31 }
 0x16f   :  { %v413_v42 = vrot.slane %v412_v41, 1 }
 0x171   :  { %v414_v43 = vadd.f32 %v413_v42, %v412_v41 }
 0x1eb   :  { %v264_v2 = vpop.xlane.xlu0 %263 }
 0x1ec   :  { %v265_v26 = vrot.slane %v264_v2, 4 }
 0x1ee   :  { %v266_v28 = vadd.f32 %v265_v26, %v264_v2 }
 0x1ef   :  { %v363_v45 = vpop.xlane.xlu0 %362 }
 0x1f0   :  { %v267_v32 = vrot.slane %v266_v28, 2  ;;  %v364_v25 = vrot.slane %v363_v45, 4 }
 0x1f2   :  { %v365_v33 = vadd.f32 %v364_v25, %v363_v45  ;;  %v268_v34 = vadd.f32 %v267_v32, %v266_v28 }
 0x1f4   :  { %v366_v51 = vrot.slane %v365_v33, 2  ;;  %v269_v39 = vrot.slane %v268_v34, 1 }
 0x1f6   :  { %v367_v40 = vadd.f32 %v366_v51, %v365_v33  ;;  %v270_v35 = vadd.f32 %v269_v39, %v268_v34 }
 0x1f8   :  { %448 = vpush %v270_v35  ;;  %v368_v57 = vrot.slane %v367_v40, 1 }
 0x1f9   :  { %450 = vpush %v332_v36 }
 0x1fa   :  { %v369_v37 = vadd.f32 %v368_v57, %v367_v40 }
 0x1fc   :  { %452 = vpush %v369_v37 }
 0x1fd   :  { %454 = vpush %v414_v43 }
 0x229   :  { %s449_s4 = spop %448 }
 0x22a   :  { %s272_s5 = ssub.f32 0.0, %s449_s4  ;;  %s451_s25 = spop %450 }
 0x22b   :  { %s334_s26 = smul.f32 4.8828126e-05, %s451_s25 }
 0x22c   :  { %s273_s27 = smul.f32 0.0078125, %s272_s5 }
 0x22d   :  { %s453_s28 = spop %452  ;;  %v421_v49 = vstv %s334_s26 }
 0x22e   :  { %v418_v47 = vstv %s273_s27  ;;  %s371_s9 = smul.f32 0.0001953125, %s453_s28  ;;  %s455_s10 = spop %454 }
 0x22f   :  { %v419_v48 = vsel %vm417_vm8, %v418_v47, 0.0  ;;  %s416_s11 = smul.f32 0.00047619047, %s455_s10 }
 0x230   :  { %v422_v50 = vsel %vm420_vm9, %v421_v49, %v419_v48  ;;  %v424_v53 = vstv %s371_s9 }
 0x231   :  { %v425_v55 = vsel %vm423_vm10, %v424_v53, %v422_v50  ;;  %v427_v0 = vstv %s416_s11 }
 0x232   :  { %v428_v56 = vsel %vm426_vm11, %v427_v0, %v425_v55 }
 0x233   :  { %429 = vst [vmem:[#allocation2] sm:$0x1] %v428_v56 }
 0x234   :  { %564 = shalt.err (!%p561_p4)
}
 0x235   :  { %439 = dma.vmem_to_hbm [thread:$0]  %s437_s30, 16, %s881_s8, [#allocation3]  }
 0x236   :  { %573 = dma.done.wait [#allocation3], 16  }
 0x237   :  { %574 = vsyncadd [#allocation3], 4294967280 }
 0x238   :  { %443 = vsyncpa [#allocation3], 1 }

</bundles_post_ra>
